<compile_context>
chip_gen: v7x
topology: tpu7x:2x2x1
jax: 0.10.0
libtpu: 0.0.40
codegen_flags: <defaults>
</compile_context>

<pallas_src>
import jax
import jax.numpy as jnp
from jax import lax
from jax.experimental import pallas as pl
from jax.experimental.pallas import tpu as pltpu


def mlp_kernel(x_ref, w1_ref, b1w2_ref, b2_ref, o_ref, acc_ref):
    # x:    (block_b, D)  bf16     w1: (tile_h, D) bf16
    # b1w2: (tile_h, 2)   f32      column 0 = b1, column 1 = w2
    # b2:   (1, 1)        f32 in SMEM
    # o:    (1, block_b)  f32      batch along lanes -> unmasked lane-dense store
    # acc:  (1, block_b)  f32 VMEM scratch (layer-2 running sum across H tiles)
    h = pl.program_id(1)
    nh = pl.num_programs(1)

    @pl.when(h == 0)
    def _():
        acc_ref[...] = jnp.zeros_like(acc_ref)

    # Layer 1, computed transposed so batch lands on the lane axis:
    #   hT = w1_tile @ x.T -> (tile_h, block_b), contracting D vs D (no .T needed),
    #   f32 accumulation from bf16 operands.
    hT = lax.dot_general(
        w1_ref[...],
        x_ref[...],
        dimension_numbers=(((1,), (1,)), ((), ())),
        preferred_element_type=jnp.float32,
    )
    b1 = b1w2_ref[:, 0:1]  # (tile_h, 1) -> broadcasts across lanes
    w2 = b1w2_ref[:, 1:2]  # (tile_h, 1)

    # sigmoid(z) = 0.5 * tanh(0.5 * z) + 0.5  -- one EUP op; muls/fma ride VALU slots.
    a = 0.5 * jnp.tanh(0.5 * (hT + b1)) + 0.5

    # Layer 2 (out_features == 1): VPU multiply + sublane reduction, no MXU use.
    acc_ref[...] += jnp.sum(a * w2, axis=0, keepdims=True)  # (1, block_b)

    @pl.when(h == nh - 1)
    def _():
        z = acc_ref[...] + b2_ref[0, 0]
        o_ref[...] = jax.nn.sigmoid(z).astype(o_ref.dtype)


def _pick_batch_tile(B):
    # Largest lane-friendly tile that divides B (128-multiples fill the MXU N dim;
    # 512-1024-wide tiles hit ~85% of HBM roofline for the streamed x).
    for cand in (1024, 512, 256, 128):
        if B % cand == 0:
            return cand
    return B  # small batch (demo path): keep the full, untiled batch dim


def _pick_h_tile(H, D, budget_bytes=8 << 20):
    # Keep the (tile_h, D) bf16 weight tile under `budget_bytes` so the resident
    # footprint stays comfortable on v7x's 64 MiB (32 MiB scoped) VMEM.
    if H * D * 2 <= budget_bytes:
        return H
    cand = max(8, (budget_bytes // (D * 2)) // 8 * 8)
    while cand >= 8:
        if H % cand == 0:
            return cand
        cand -= 8
    return H  # no clean divisor: fully resident (correct; may rely on vmem_limit)


def _block_spec(shape, index_map, buffers=None):
    # Grid-invariant operands only need one buffer; fall back gracefully if this
    # jax version lacks pipeline_mode.
    if buffers is not None:
        try:
            return pl.BlockSpec(shape, index_map, pipeline_mode=pl.Buffered(buffers))
        except TypeError:
            pass
    return pl.BlockSpec(shape, index_map)


def mlp_forward(x, w1, b1, w2, b2, *, block_b=None, tile_h=None):
    B, D = x.shape
    H = w1.shape[0]

    if block_b is None:
        block_b = _pick_batch_tile(B)
    assert B % block_b == 0, "wrapper assumes batch divisible by the batch tile"
    if tile_h is None:
        tile_h = _pick_h_tile(H, D)
    assert H % tile_h == 0

    nb = B // block_b
    nh = H // tile_h
    grid = (nb, nh)
    # TODO(synk): on v7x, B <= block_b gives a 1-step batch grid and leaves one
    # TensorCore idle; shrink block_b (or core_map) when B is large enough.

    # Single-buffer the weights when they are fully resident (constant index map);
    # stream (double-buffer) them when the H axis is tiled.
    w_buffers = 1 if nh == 1 else None

    # bf16 streaming for the MXU operands; accumulation stays f32 in-kernel.
    x_bf = x.astype(jnp.bfloat16)
    w1_bf = w1.astype(jnp.bfloat16)

    # Layout plumbing (free, wrapper side): b1|w2 share one (H, 2) slab so only a
    # single lane-padded (H, 128) VMEM buffer exists; b2 is an SMEM scalar.
    b1w2 = jnp.concatenate([b1.reshape(H, 1), w2.reshape(H, 1)], axis=1)
    b2s = b2.reshape(1, 1)

    # Explicit VMEM budget (v5e scoped default is only 16 MiB; v7x physical 64 MiB).
    w_bufs = 1 if nh == 1 else 2
    vmem_need = (
        2 * block_b * D * 2                # x: bf16, double-buffered
        + w_bufs * tile_h * D * 2          # w1: bf16
        + w_bufs * tile_h * 128 * 4        # b1|w2: f32, lane-padded to 128
        + 2 * max(block_b, 128) * 4        # output tile (double-buffered)
        + max(block_b, 128) * 4            # accumulator scratch
    )
    vmem_limit = int(min(max(2 * vmem_need + (4 << 20), 16 << 20), 48 << 20))

    cost = pl.CostEstimate(
        flops=2 * B * D * H + 2 * B * H,
        transcendentals=B * H + B,
        bytes_accessed=(x_bf.size * 2 + nb * w1_bf.size * 2
                        + nb * b1w2.size * 4 + B * 4),
    )

    out = pl.pallas_call(
        mlp_kernel,
        out_shape=jax.ShapeDtypeStruct((1, B), jnp.float32),
        grid_spec=pltpu.PrefetchScalarGridSpec(
            num_scalar_prefetch=0,
            grid=grid,
            in_specs=[
                pl.BlockSpec((block_b, D), lambda i, h: (i, 0)),           # x streamed
                _block_spec((tile_h, D), lambda i, h: (h, 0), w_buffers),  # w1
                _block_spec((tile_h, 2), lambda i, h: (h, 0), w_buffers),  # b1|w2
                pl.BlockSpec(memory_space=pltpu.MemorySpace.SMEM),         # b2 scalar
            ],
            out_specs=pl.BlockSpec((1, block_b), lambda i, h: (0, i)),     # lane-dense
            scratch_shapes=[pltpu.VMEM((1, block_b), jnp.float32)],
        ),
        compiler_params=pltpu.CompilerParams(
            dimension_semantics=("parallel", "arbitrary"),
            vmem_limit_bytes=vmem_limit,
        ),
        cost_estimate=cost,
    )(x_bf, w1_bf, b1w2, b2s)

    # Back to the PyTorch output convention (B, 1).
    return out.reshape(B, 1)


def init_params(key, input_size):
    """Deterministic init mimicking nn.Linear's U(-1/sqrt(fan_in), 1/sqrt(fan_in))."""
    hidden = input_size // 2
    k1, k2, k3, k4 = jax.random.split(key, 4)
    bound1 = 1.0 / jnp.sqrt(input_size)
    bound2 = 1.0 / jnp.sqrt(hidden)
    w1 = jax.random.uniform(k1, (hidden, input_size), jnp.float32, -bound1, bound1)
    b1 = jax.random.uniform(k2, (1, hidden), jnp.float32, -bound1, bound1)
    w2 = jax.random.uniform(k3, (1, hidden), jnp.float32, -bound2, bound2)
    b2 = jax.random.uniform(k4, (1, 1), jnp.float32, -bound2, bound2)
    return w1, b1, w2, b2


if __name__ == "__main__":
    batch = 8
    input_size = 32

    key = jax.random.PRNGKey(0)
    kx, kp = jax.random.split(key)
    x = jax.random.normal(kx, (batch, input_size), dtype=jnp.float32)
    w1, b1, w2, b2 = init_params(kp, input_size)

    out = mlp_forward(x, w1, b1, w2, b2)
    out = jax.block_until_ready(out)

    # Reference check in plain JAX (same math as the PyTorch forward), f32.
    ref = jax.nn.sigmoid(jax.nn.sigmoid(x @ w1.T + b1) @ w2.T + b2)
    assert out.shape == (batch, 1)
    # bf16 MXU operands (f32 accumulation) -> loosened tolerance vs f32 reference.
    assert jnp.allclose(out, ref, atol=2e-2, rtol=2e-2), (
        f"max abs err {float(jnp.max(jnp.abs(out - ref)))}")

    print("KERNEL_OK")
</pallas_src>

<mosaic_0001>
module attributes {stable_mosaic.version = 11 : i64} {
  func.func @mlp_kernel(%arg0: i32, %arg1: i32, %arg2: memref<8x32xbf16, #tpu.memory_space<vmem>>, %arg3: memref<16x32xbf16, #tpu.memory_space<vmem>>, %arg4: memref<16x2xf32, #tpu.memory_space<vmem>>, %arg5: memref<1x1xf32, #tpu.memory_space<smem>>, %arg6: memref<1x8xf32, #tpu.memory_space<vmem>>, %arg7: memref<1x8xf32, #tpu.memory_space<vmem>>) attributes {dimension_semantics = [#tpu.dimension_semantics<parallel>, #tpu.dimension_semantics<arbitrary>], iteration_bounds = array<i64: 1, 1>, scalar_prefetch = 0 : i64, scratch_operands = 1 : i64, tpu.core_type = #tpu.core_type<tc>, window_params = [{transform_indices = @transform_0, window_bounds = array<i64: 8, 32>}, {pipeline_mode = #tpu.pipeline_mode<synchronous>, transform_indices = @transform_1, window_bounds = array<i64: 16, 32>}, {pipeline_mode = #tpu.pipeline_mode<synchronous>, transform_indices = @transform_2, window_bounds = array<i64: 16, 2>}, {transform_indices = @transform_3, window_bounds = array<i64: 1, 1>}, {transform_indices = @transform_4, window_bounds = array<i64: 1, 8>}]} {
    %c0_i32 = arith.constant 0 : i32
    %0 = arith.cmpi eq, %arg1, %c0_i32 : i32
    %1 = arith.extui %0 : i1 to i32
    %c0_i32_0 = arith.constant 0 : i32
    %2 = arith.cmpi ne, %1, %c0_i32_0 : i32
    scf.if %2 {
      %cst_17 = arith.constant 0.000000e+00 : f32
      %27 = vector.broadcast %cst_17 : f32 to vector<1x8xf32>
      %c0_18 = arith.constant 0 : index
      %c0_19 = arith.constant 0 : index
      %28 = vector.load %arg7[%c0_18, %c0_19] : memref<1x8xf32, #tpu.memory_space<vmem>>, vector<1x8xf32>
      tpu.vector_store %arg7[%c0_18, %c0_19], %27 {strides = array<i32>} : memref<1x8xf32, #tpu.memory_space<vmem>>, vector<1x8xf32>,
    } else {
    }
    %c0 = arith.constant 0 : index
    %c0_1 = arith.constant 0 : index
    %3 = vector.load %arg3[%c0, %c0_1] : memref<16x32xbf16, #tpu.memory_space<vmem>>, vector<16x32xbf16>
    %c0_2 = arith.constant 0 : index
    %c0_3 = arith.constant 0 : index
    %4 = vector.load %arg2[%c0_2, %c0_3] : memref<8x32xbf16, #tpu.memory_space<vmem>>, vector<8x32xbf16>
    %cst = arith.constant dense<0.000000e+00> : vector<16x8xf32>
    %5 = tpu.matmul %3, %4, %cst {dimension_numbers = #tpu.dot_dimension_numbers<[1], [1], [0], [0], [0, 0, 1, 0], [], []>} : vector<16x32xbf16>, vector<8x32xbf16>, vector<16x8xf32> -> vector<16x8xf32>
    %c0_4 = arith.constant 0 : index
    %c0_5 = arith.constant 0 : index
    %6 = vector.load %arg4[%c0_4, %c0_5] : memref<16x2xf32, #tpu.memory_space<vmem>>, vector<16x1xf32>
    %c0_6 = arith.constant 0 : index
    %c1 = arith.constant 1 : index
    %7 = vector.load %arg4[%c0_6, %c1] : memref<16x2xf32, #tpu.memory_space<vmem>>, vector<16x1xf32>
    %8 = vector.broadcast %6 : vector<16x1xf32> to vector<16x8xf32>
    %9 = arith.addf %5, %8 : vector<16x8xf32>
    %cst_7 = arith.constant 5.000000e-01 : f32
    %10 = vector.broadcast %cst_7 : f32 to vector<16x8xf32>
    %11 = arith.mulf %10, %9 : vector<16x8xf32>
    %12 = math.tanh %11 : vector<16x8xf32>
    %cst_8 = arith.constant 5.000000e-01 : f32
    %13 = vector.broadcast %cst_8 : f32 to vector<16x8xf32>
    %14 = arith.mulf %13, %12 : vector<16x8xf32>
    %cst_9 = arith.constant 5.000000e-01 : f32
    %15 = vector.broadcast %cst_9 : f32 to vector<16x8xf32>
    %16 = arith.addf %14, %15 : vector<16x8xf32>
    %c0_10 = arith.constant 0 : index
    %c0_11 = arith.constant 0 : index
    %17 = vector.load %arg7[%c0_10, %c0_11] : memref<1x8xf32, #tpu.memory_space<vmem>>, vector<1x8xf32>
    %18 = vector.broadcast %7 : vector<16x1xf32> to vector<16x8xf32>
    %19 = arith.mulf %16, %18 : vector<16x8xf32>
    %cst_12 = arith.constant dense<0.000000e+00> : vector<8xf32>
    %20 = vector.multi_reduction <add>, %19, %cst_12 [0] : vector<16x8xf32> to vector<8xf32>
    %21 = vector.shape_cast %20 : vector<8xf32> to vector<1x8xf32>
    %22 = arith.addf %17, %21 : vector<1x8xf32>
    %c0_13 = arith.constant 0 : index
    %c0_14 = arith.constant 0 : index
    %23 = vector.load %arg7[%c0_13, %c0_14] : memref<1x8xf32, #tpu.memory_space<vmem>>, vector<1x8xf32>
    tpu.vector_store %arg7[%c0_13, %c0_14], %22 {strides = array<i32>} : memref<1x8xf32, #tpu.memory_space<vmem>>, vector<1x8xf32>,
    %c0_i32_15 = arith.constant 0 : i32
    %24 = arith.cmpi eq, %arg1, %c0_i32_15 : i32
    %25 = arith.extui %24 : i1 to i32
    %c0_i32_16 = arith.constant 0 : i32
    %26 = arith.cmpi ne, %25, %c0_i32_16 : i32
    scf.if %26 {
      %c0_17 = arith.constant 0 : index
      %c0_18 = arith.constant 0 : index
      %27 = vector.load %arg7[%c0_17, %c0_18] : memref<1x8xf32, #tpu.memory_space<vmem>>, vector<1x8xf32>
      %c0_19 = arith.constant 0 : index
      %c0_20 = arith.constant 0 : index
      %28 = memref.load %arg5[%c0_19, %c0_20] : memref<1x1xf32, #tpu.memory_space<smem>>
      %29 = vector.broadcast %28 : f32 to vector<1x8xf32>
      %30 = arith.addf %27, %29 : vector<1x8xf32>
      %31 = arith.negf %30 : vector<1x8xf32>
      %32 = math.exp %31 : vector<1x8xf32>
      %cst_21 = arith.constant 1.000000e+00 : f32
      %33 = vector.broadcast %cst_21 : f32 to vector<1x8xf32>
      %34 = arith.addf %33, %32 : vector<1x8xf32>
      %35 = arith.divf %33, %34 : vector<1x8xf32>
      %c0_22 = arith.constant 0 : index
      %c0_23 = arith.constant 0 : index
      %36 = vector.load %arg6[%c0_22, %c0_23] : memref<1x8xf32, #tpu.memory_space<vmem>>, vector<1x8xf32>
      tpu.vector_store %arg6[%c0_22, %c0_23], %35 {strides = array<i32>} : memref<1x8xf32, #tpu.memory_space<vmem>>, vector<1x8xf32>,
    } else {
    }
    return
  }
  func.func @transform_0(%arg0: i32, %arg1: i32) -> (i32, i32) {
    %c0_i32 = arith.constant 0 : i32
    %c0_i32_0 = arith.constant 0 : i32
    return %arg0, %c0_i32 : i32, i32
  }
  func.func @transform_1(%arg0: i32, %arg1: i32) -> (i32, i32) {
    %c0_i32 = arith.constant 0 : i32
    %c0_i32_0 = arith.constant 0 : i32
    return %arg1, %c0_i32 : i32, i32
  }
  func.func @transform_2(%arg0: i32, %arg1: i32) -> (i32, i32) {
    %c0_i32 = arith.constant 0 : i32
    %c0_i32_0 = arith.constant 0 : i32
    return %arg1, %c0_i32 : i32, i32
  }
  func.func @transform_3(%arg0: i32, %arg1: i32) -> (i32, i32) {
    %c0_i32 = arith.constant 0 : i32
    %c0_i32_0 = arith.constant 0 : i32
    %c0_i32_1 = arith.constant 0 : i32
    return %c0_i32, %c0_i32_0 : i32, i32
  }
  func.func @transform_4(%arg0: i32, %arg1: i32) -> (i32, i32) {
    %c0_i32 = arith.constant 0 : i32
    %c0_i32_0 = arith.constant 0 : i32
    return %c0_i32, %arg0 : i32, i32
  }
}

</mosaic_0001>

<bundles_post_ra>
// kernel: tpu_custom_call.1
= control target key start
LH: loop header
LB: loop body
LE: loop exit
PB: predicated region body
PF: predicated region fallthrough
CT: control target
= control target key end

     0   :  { %vm24_vm0 = vcmask 57344   ;;  %vm46_vm1 = vcmask 261120   ;;  %v206_v1 = vmov 0.0   ;;  %vm207_vm2 = vmmov 0   ;;  %s268_s0 = inlined_call_operand.vmem [shape: bf16[8,32], index: 0, kind: input, shape index: {}]   ;;  %s269_s1 = inlined_call_operand.vmem [shape: bf16[16,32], index: 1, kind: input, shape index: {}]   ;;  %s270_s2 = inlined_call_operand.vmem [shape: f32[16,2], index: 2, kind: input, shape index: {}]   ;;  %s271_s3 = inlined_call_operand.<no memory space> [shape: f32[1,1], index: 3, kind: input, shape index: {}]   ;;  %s272_s4 = inlined_call_operand.hbm [shape: f32[1,8], index: 4, kind: output, shape index: {}]  }
   0x1   :  { %v28_v0 = vld [vmem:[%s268_s0] sm:$0xf]  ;;  %25 = vst.msk [vmem:[#allocation2] sm:$0x1] %vm24_vm0, %v206_v1  ;;  %159 = vmatprep.subr.bf16.mxu0 %v206_v1  ;;  %161 = vmatprep.mubr.msk.bf16.mxu0 %vm207_vm2, %v206_v1 }
   0x2   :  { %v51_v2 = vsel %vm46_vm1, %v28_v0, 0  ;;  %v29_v3 = vld [vmem:[%s270_s2] sm:$0xff] }
   0x3   :  { %160 = vmatpush3.bf16.xpose.msra.mxu0 %v51_v2 }
   0x4   :  { %10 = vsyncpa [#allocation5], 0  ;;  %v208_v4 = vmov 0   ;;  %v209_v5 = vmov 1   ;;  %v173_v6 = vld [vmem:[%s269_s1] sm:$0xff]   ;;  %v30_v7 = vld [vmem:[%s270_s2 + $0x8] sm:$0xff]  ;;  %v131_v39 = vstv %s271_s3 }
   0x5   :  { %170 = vset.pattern.permute.xlu0 %v208_v4  ;;  %171 = vset.pattern.permute.xlu1 %v209_v5  ;;  %vm113_vm3 = vcmask 64512   ;;  %s210_s22 = smov [#allocation4]  }
   0x6   :  { %33 = vperm.xlu0 %170, %v29_v3   ;;  %104 = vperm.xlu1 %171, %v29_v3   ;;  %s146_s23 = sshll.u32 %s210_s22, 4  ;;  %s147_s23 = int_to_ptr.vmem [resolvable:$true] %s146_s23 }
   0x7   :  { %s182_s24 = scalar_lea.vmem %s147_s23, 16  ;;  %s186_s25 = scalar_lea.vmem %s147_s23, 32 }
   0x8   :  { %v102_v36 = vld [vmem:[#allocation2] sm:$0x1]  ;;  %p183_p0 = scmp.ne.s32.totalorder %s147_s23, %s182_s24  ;;  %p187_p1 = scmp.lt.s32.totalorder %s147_s23, %s147_s23 }
   0x9   :  { %p188_p2 = scmp.lt.s32.totalorder %s186_s25, %s182_s24 }
   0xa   :  { %38 = vperm.xlu0 %170, %v30_v7   ;;  %108 = vperm.xlu1 %171, %v30_v7  }
   0xb   :  { %162 = vmatmul.mubr.msk.bf16.vlgmr.msra.gmra.mrb[0].mxu0 %vm46_vm1, %v173_v6  ;;  %p189_p3 = por %p188_p2, %p187_p1 }
   0xd   :  { %p190_p4 = pnand %p189_p3, %p183_p0 }
   0xe   :  { %172 = vset.pattern.permute.xlu0 %v209_v5 }
  0x85   :  { %v34_v8 = vpop.permute.xlu0 %33  ;;  %v105_v19 = vpop.permute.xlu1 %104 }
  0x89   :  { %v39_v12 = vpop.permute.xlu0 %38  ;;  %v109_v26 = vpop.permute.xlu1 %108 }
  0xde   :  { %v87_v9 = vpop.f32.mrb[0].mxu0 }
  0xdf   :  { %v88_v10 = vadd.f32 %v87_v9, %v34_v8  ;;  %v163_v11 = vpop.f32.mrb[1].mxu0 }
  0xe0   :  { %v90_v13 = vpop.f32.mrb[2].mxu0 }
  0xe1   :  { %v94_v14 = vmul.f32 0.5, %v88_v10  ;;  %v91_v15 = vadd.f32 %v90_v13, %v39_v12  ;;  %v164_v16 = vpop.f32.mrb[3].mxu0 }
  0xe3   :  { %174 = vtanh.f32 %v94_v14  ;;  %v95_v17 = vmul.f32 0.5, %v91_v15 }
  0xe5   :  { %176 = vtanh.f32 %v95_v17 }
  0xed   :  { %v175_v18 = vpop.eup %174 }
  0xee   :  { %v98_v20 = vmul.f32 0.5, %v175_v18 }
  0xef   :  { %v177_v21 = vpop.eup %176 }
  0xf0   :  { %v100_v22 = vadd.f32 0.5, %v98_v20  ;;  %v99_v23 = vmul.f32 0.5, %v177_v21 }
  0xf2   :  { %v111_v24 = vmul.f32 %v105_v19, %v100_v22  ;;  %v101_v25 = vadd.f32 0.5, %v99_v23 }
  0xf4   :  { %v112_v27 = vmul.f32 %v109_v26, %v101_v25  ;;  %v114_v28 = vsel %vm113_vm3, %v111_v24, 0.0 }
  0xf6   :  { %v115_v29 = vsel %vm113_vm3, %v112_v27, 0.0 }
  0xf7   :  { %v116_v30 = vadd.f32 %v115_v29, %v114_v28 }
  0xf9   :  { %v117_v31 = vrot.slane %v116_v30, 4 }
  0xfb   :  { %v118_v32 = vadd.f32 %v117_v31, %v116_v30 }
  0xfd   :  { %v119_v33 = vrot.slane %v118_v32, 2 }
  0xff   :  { %v120_v34 = vadd.f32 %v119_v33, %v118_v32 }
 0x101   :  { %v121_v35 = vrot.slane %v120_v34, 1 }
 0x103   :  { %v122_v37 = vadd.f32 %v121_v35, %v120_v34 }
 0x105   :  { %v123_v38 = vadd.f32 %v122_v37, %v102_v36 }
 0x107   :  { %125 = vst.msk [vmem:[#allocation2] sm:$0x1] %vm24_vm0, %v123_v38 }
 0x10e   :  { %v129_v40 = vld [vmem:[#allocation2] sm:$0x1] }
 0x10f   :  { %v132_v41 = vadd.f32 %v131_v39, %v129_v40 }
 0x111   :  { %v156_v42 = vmul.f32 -1.442695, %v132_v41 }
 0x113   :  { %178 = vpow2.f32 %v156_v42 }
 0x11d   :  { %v179_v43 = vpop.eup %178 }
 0x11e   :  { %v136_v44 = vadd.f32 1.0, %v179_v43 }
 0x120   :  { %180 = vrcp.f32 %v136_v44 }
 0x12a   :  { %v181_v45 = vpop.eup %180 }
 0x12b   :  { %139 = vst.msk [vmem:[#allocation4] sm:$0x1] %vm24_vm0, %v181_v45 }
 0x12c   :  { %193 = shalt.err (!%p190_p4)
}
 0x12d   :  { %s194_s27 = scalar_lea.hbm %s272_s4, 16 }
 0x12e   :  { %p195_p5 = scmp.ne.s32.totalorder %s272_s4, %s194_s27  ;;  %p198_p6 = scmp.lt.u32.totalorder %s194_s27, %s272_s4 }
 0x130   :  { %p200_p7 = pnand %p198_p6, %p195_p5 }
 0x132   :  { %203 = shalt.err (!%p200_p7)
}
 0x133   :  { %149 = dma.vmem_to_hbm [thread:$0]  %s147_s23, 16, %s272_s4, [#allocation5]  }
 0x134   :  { %204 = dma.done.wait [#allocation5], 16  }
 0x135   :  { %205 = vsyncadd [#allocation5], 4294967280 }
 0x136   :  { %153 = vsyncpa [#allocation5], 1 }

</bundles_post_ra>
